<compile_context>
chip_gen: v5e
topology: v5e:2x2
jax: 0.10.0
libtpu: 0.0.40
codegen_flags: <defaults>
</compile_context>

<pallas_src>
import math
import functools

import jax
import jax.numpy as jnp
from jax import lax
from jax.experimental import pallas as pl
from jax.experimental.pallas import tpu as pltpu


_MASK_VALUE = -1e30  # finite "-inf": identical softmax result (diagonal never masked), NaN-safe


def _layer_norm(v, w, b, eps=1e-5):
    mu = jnp.mean(v, axis=-1, keepdims=True)
    var = jnp.mean((v - mu) ** 2, axis=-1, keepdims=True)
    return (v - mu) * lax.rsqrt(var + eps) * w + b


def _block_kernel(x_ref,
                  ln1_w_ref, ln1_b_ref, ln2_w_ref, ln2_b_ref,
                  wqkv_ref, bqkv_ref, wo_ref, bo_ref,
                  w1_ref, b1_ref, w2_ref, b2_ref,
                  o_ref,
                  qkv_ref, attn_ref,
                  *, num_heads, embed_dim, seq_len, batch_block):
    E = embed_dim
    H = num_heads
    dh = E // H
    L = seq_len
    B = batch_block
    cdt = wqkv_ref.dtype                       # matmul operand dtype (bf16)

    ln1_w = ln1_w_ref[...]; ln1_b = ln1_b_ref[...]
    ln2_w = ln2_w_ref[...]; ln2_b = ln2_b_ref[...]
    wqkv = wqkv_ref[...]                       # (E, 3E), q-columns pre-scaled by 1/sqrt(dh)
    bqkv = bqkv_ref[...]                       # (1, 3E) f32 (q part pre-scaled)
    wo = wo_ref[...]                           # (E, E)
    bo = bo_ref[...]                           # (1, E)
    w1 = w1_ref[...]; b1 = b1_ref[...]
    w2 = w2_ref[...]; b2 = b2_ref[...]

    # ---- ln_1 over the whole (B*L, E) slab ----
    x = x_ref[...]                             # (B*L, E) f32, batch-major rows
    xn = _layer_norm(x, ln1_w, ln1_b)

    # ---- fused QKV projection: one MXU pass with M = B*L, N = 3E ----
    qkv_ref[...] = jnp.dot(xn.astype(cdt), wqkv,
                           preferred_element_type=jnp.float32) + bqkv    # (B*L, 3E) f32

    # Causal mask, hoisted out of all loops.
    row = lax.broadcasted_iota(jnp.int32, (L, L), 0)
    col = lax.broadcasted_iota(jnp.int32, (L, L), 1)
    keep = col <= row

    # ---- causal multi-head self-attention (only the score/PV part is per-batch) ----
    # Each head's PV result is written head-major into attn_ref; the head-concat + output
    # projection then collapses to ONE K=E matmul on the whole slab.
    # TODO(synk): for long L, tile over KV blocks (online softmax); for large E, pad dh to a
    # 128-lane multiple / use head-major einshape to avoid sub-128 lane slices, and on v7x
    # (64 MiB VMEM) single-buffer the weight specs and tile the MLP over the 4E dim.
    def batch_body(b, carry):
        base = pl.multiple_of(b * L, L)
        for h in range(H):                     # static over heads; scratch bounds live ranges
            lo, hi = h * dh, (h + 1) * dh
            qh = qkv_ref[pl.ds(base, L), lo:hi].astype(cdt)            # (L, dh)
            kh = qkv_ref[pl.ds(base, L), E + lo:E + hi].astype(cdt)
            vh = qkv_ref[pl.ds(base, L), 2 * E + lo:2 * E + hi].astype(cdt)
            s = lax.dot_general(qh, kh, (((1,), (1,)), ((), ())),
                                preferred_element_type=jnp.float32)    # (L, L) = q @ k^T
            s = jnp.where(keep, s, _MASK_VALUE)
            s = s - jnp.max(s, axis=-1, keepdims=True)
            p = jnp.exp(s)
            p = p * pl.reciprocal(jnp.sum(p, axis=-1, keepdims=True), approx=True)
            hv = jnp.dot(p.astype(cdt), vh, preferred_element_type=jnp.float32)  # (L, dh)
            attn_ref[pl.ds(base, L), lo:hi] = hv
        return carry

    lax.fori_loop(0, B, batch_body, 0)

    # ---- head-concat + out-projection as a single (B*L, E) @ (E, E) matmul ----
    a = jnp.dot(attn_ref[...].astype(cdt), wo, preferred_element_type=jnp.float32) + bo

    # residual added to the layer-normed x, exactly as in the reference module
    x1 = xn + a

    # ---- ln_2 + MLP on the whole slab ----
    xn2 = _layer_norm(x1, ln2_w, ln2_b)
    h1 = jnp.dot(xn2.astype(cdt), w1, preferred_element_type=jnp.float32) + b1  # (B*L, 4E)
    g = jax.nn.gelu(h1, approximate=True)      # tanh GELU -> EUP slot (erf has no EUP path)
    m = jnp.dot(g.astype(cdt), w2, preferred_element_type=jnp.float32) + b2

    # single lane-dense slab store
    o_ref[...] = (x1 + m).astype(o_ref.dtype)


def _vmem_capacity_bytes():
    try:
        return int(pltpu.get_tpu_info().vmem_capacity_bytes)
    except Exception:
        return 64 << 20    # conservative default (v7x per-TensorCore VMEM)


def _vmem_estimate(b_blk, L, E, weight_bytes):
    """Rough per-step VMEM footprint: double-buffered weights + I/O blocks, f32 scratch
    (qkv 3E + attn E), and the main live f32 intermediates (xn, x1, h1/g ~ 4E each)."""
    M = b_blk * L
    io = 2 * 2 * M * E * 4
    scratch = M * 4 * E * 4
    live = M * 12 * E * 4
    return 2 * weight_bytes + io + scratch + live


def _pick_batch_block(N, L, E, weight_bytes, vmem_cap):
    """Batch elements per grid step: as many as the VMEM budget allows (big matmul M dim,
    fewer grid steps) while keeping >=2 grid steps when possible (v7x has 2 TensorCores
    sharded over the 'parallel' axis) and respecting the sublane-8 block rule."""
    budget = int(0.45 * vmem_cap)
    candidates = []
    for b in range(1, N + 1):
        if N % b:
            continue
        if not (b == N or (b * L) % 8 == 0):     # block 2nd-to-last dim: full axis or 8-multiple
            continue
        if _vmem_estimate(b, L, E, weight_bytes) > budget:
            continue
        candidates.append(b)
    if not candidates:
        return 1 if (L % 8 == 0 or N == 1) else N
    multi_step = [b for b in candidates if N // b >= 2]
    return max(multi_step) if multi_step else max(candidates)


def _prepare_kernel_params(p, num_heads, matmul_dtype=jnp.bfloat16):
    """Glue: pre-transpose weights, fuse q|k|v, fold attention scale, cast matmul weights."""
    E = p["out_w"].shape[0]
    dh = E // num_heads
    scale = 1.0 / math.sqrt(dh)
    Wq, Wk, Wv = p["in_proj_w"][:E], p["in_proj_w"][E:2 * E], p["in_proj_w"][2 * E:]
    bq, bk, bv = p["in_proj_b"][:E], p["in_proj_b"][E:2 * E], p["in_proj_b"][2 * E:]
    wqkv = jnp.concatenate([Wq.T * scale, Wk.T, Wv.T], axis=1)          # (E, 3E)
    bqkv = jnp.concatenate([bq * scale, bk, bv]).reshape(1, 3 * E)
    row = lambda v: v.reshape(1, -1)
    return {
        "ln1_w": row(p["ln1_w"]), "ln1_b": row(p["ln1_b"]),
        "ln2_w": row(p["ln2_w"]), "ln2_b": row(p["ln2_b"]),
        "wqkv": wqkv.astype(matmul_dtype), "bqkv": bqkv.astype(jnp.float32),
        "wo": p["out_w"].T.astype(matmul_dtype), "bo": row(p["out_b"]),
        "w1": p["w1"].T.astype(matmul_dtype), "b1": row(p["b1"]),
        "w2": p["w2"].T.astype(matmul_dtype), "b2": row(p["b2"]),
    }


def block_forward(x_lne, params, num_heads, matmul_dtype=jnp.bfloat16):
    """x_lne: (L, N, E) float32 -- same layout as the PyTorch reference."""
    L, N, E = x_lne.shape
    assert E % num_heads == 0

    kp = _prepare_kernel_params(params, num_heads, matmul_dtype)
    names = ["ln1_w", "ln1_b", "ln2_w", "ln2_b", "wqkv", "bqkv",
             "wo", "bo", "w1", "b1", "w2", "b2"]
    weights = [kp[n] for n in names]
    weight_bytes = sum(int(w.size) * w.dtype.itemsize for w in weights)

    vmem_cap = _vmem_capacity_bytes()
    B_blk = _pick_batch_block(N, L, E, weight_bytes, vmem_cap)
    grid = (N // B_blk,)
    M_blk = B_blk * L

    # Batch-major rows: (L, N, E) -> (N, L, E) -> (N*L, E) so LayerNorm / QKV / out-proj /
    # MLP all see an M = B_blk*L matmul dimension and the output store is one full slab.
    x_bm = jnp.transpose(x_lne, (1, 0, 2)).reshape(N * L, E)

    in_specs = [pl.BlockSpec((M_blk, E), lambda b: (b, 0))]
    in_specs += [pl.BlockSpec(w.shape, lambda b: (0, 0)) for w in weights]
    out_spec = pl.BlockSpec((M_blk, E), lambda b: (b, 0))

    est = _vmem_estimate(B_blk, L, E, weight_bytes)
    vmem_limit = int(min(int(0.9 * vmem_cap), max(32 << 20, 2 * est)))

    out2d = pl.pallas_call(
        functools.partial(_block_kernel, num_heads=num_heads, embed_dim=E,
                          seq_len=L, batch_block=B_blk),
        out_shape=jax.ShapeDtypeStruct((N * L, E), jnp.float32),
        grid=grid,
        in_specs=in_specs,
        out_specs=out_spec,
        scratch_shapes=[pltpu.VMEM((M_blk, 3 * E), jnp.float32),   # fused qkv
                        pltpu.VMEM((M_blk, E), jnp.float32)],      # head-major attention out
        compiler_params=pltpu.CompilerParams(
            dimension_semantics=("parallel",),
            vmem_limit_bytes=vmem_limit),
    )(x_bm, *weights)

    return out2d.reshape(N, L, E).transpose(1, 0, 2)


def block_reference(x_lne, p, num_heads):
    """Pure-JAX f32 reference mirroring the PyTorch module (for validation)."""
    L, N, E = x_lne.shape
    dh = E // num_heads
    scale = 1.0 / math.sqrt(dh)
    Wq, Wk, Wv = p["in_proj_w"][:E], p["in_proj_w"][E:2 * E], p["in_proj_w"][2 * E:]
    bq, bk, bv = p["in_proj_b"][:E], p["in_proj_b"][E:2 * E], p["in_proj_b"][2 * E:]

    def single(xs):                             # xs: (L, E)
        xn = _layer_norm(xs, p["ln1_w"], p["ln1_b"])
        q = xn @ Wq.T + bq
        k = xn @ Wk.T + bk
        v = xn @ Wv.T + bv
        qh = q.reshape(L, num_heads, dh).transpose(1, 0, 2)
        kh = k.reshape(L, num_heads, dh).transpose(1, 0, 2)
        vh = v.reshape(L, num_heads, dh).transpose(1, 0, 2)
        s = jnp.einsum("hld,hmd->hlm", qh, kh) * scale
        mask = jnp.triu(jnp.full((L, L), -jnp.inf, jnp.float32), k=1)
        pr = jax.nn.softmax(s + mask, axis=-1)
        o = jnp.einsum("hlm,hmd->hld", pr, vh).transpose(1, 0, 2).reshape(L, E)
        a = o @ p["out_w"].T + p["out_b"]
        x1 = xn + a
        xn2 = _layer_norm(x1, p["ln2_w"], p["ln2_b"])
        m = (jax.nn.gelu(xn2 @ p["w1"].T + p["b1"], approximate=False)
             @ p["w2"].T + p["b2"])
        return x1 + m

    out = jax.vmap(single)(jnp.transpose(x_lne, (1, 0, 2)))
    return jnp.transpose(out, (1, 0, 2))


def init_params(key, embed_dim):
    """Deterministic synthetic f32 parameters in PyTorch-native shapes."""
    E = embed_dim
    ks = jax.random.split(key, 12)
    std = 0.02
    return {
        "in_proj_w": jax.random.normal(ks[0], (3 * E, E), jnp.float32) * std,
        "in_proj_b": jax.random.normal(ks[1], (3 * E,), jnp.float32) * std,
        "out_w": jax.random.normal(ks[2], (E, E), jnp.float32) * std,
        "out_b": jax.random.normal(ks[3], (E,), jnp.float32) * std,
        "w1": jax.random.normal(ks[4], (4 * E, E), jnp.float32) * std,
        "b1": jax.random.normal(ks[5], (4 * E,), jnp.float32) * std,
        "w2": jax.random.normal(ks[6], (E, 4 * E), jnp.float32) * std,
        "b2": jax.random.normal(ks[7], (E,), jnp.float32) * std,
        "ln1_w": 1.0 + 0.1 * jax.random.normal(ks[8], (E,), jnp.float32),
        "ln1_b": 0.1 * jax.random.normal(ks[9], (E,), jnp.float32),
        "ln2_w": 1.0 + 0.1 * jax.random.normal(ks[10], (E,), jnp.float32),
        "ln2_b": 0.1 * jax.random.normal(ks[11], (E,), jnp.float32),
    }


if __name__ == "__main__":
    L, N, E, H = 8, 2, 32, 4     # seq=8, batch=2, embed_dim=32, num_heads=4
    key = jax.random.PRNGKey(0)
    kx, kp = jax.random.split(key)
    x = jax.random.normal(kx, (L, N, E), jnp.float32)   # (seq, batch, embed), torch layout
    params = init_params(kp, E)

    out = block_forward(x, params, H)
    out = jax.block_until_ready(out)

    ref = block_reference(x, params, H)
    assert out.shape == (L, N, E)
    err = float(jnp.max(jnp.abs(out - ref)))
    # bf16 matmul operands + approx reciprocal + tanh-GELU vs the f32/erf reference -> ~1e-3
    assert err < 1e-2, err
    print("KERNEL_OK")
</pallas_src>

<mosaic_0001>
module attributes {stable_mosaic.version = 11 : i64} {
  func.func @_block_kernel(%arg0: i32, %arg1: memref<8x32xf32, #tpu.memory_space<vmem>>, %arg2: memref<1x32xf32, #tpu.memory_space<vmem>>, %arg3: memref<1x32xf32, #tpu.memory_space<vmem>>, %arg4: memref<1x32xf32, #tpu.memory_space<vmem>>, %arg5: memref<1x32xf32, #tpu.memory_space<vmem>>, %arg6: memref<32x96xbf16, #tpu.memory_space<vmem>>, %arg7: memref<1x96xf32, #tpu.memory_space<vmem>>, %arg8: memref<32x32xbf16, #tpu.memory_space<vmem>>, %arg9: memref<1x32xf32, #tpu.memory_space<vmem>>, %arg10: memref<32x128xbf16, #tpu.memory_space<vmem>>, %arg11: memref<1x128xf32, #tpu.memory_space<vmem>>, %arg12: memref<128x32xbf16, #tpu.memory_space<vmem>>, %arg13: memref<1x32xf32, #tpu.memory_space<vmem>>, %arg14: memref<8x32xf32, #tpu.memory_space<vmem>>, %arg15: memref<8x96xf32, #tpu.memory_space<vmem>>, %arg16: memref<8x32xf32, #tpu.memory_space<vmem>>) attributes {dimension_semantics = [#tpu.dimension_semantics<parallel>], iteration_bounds = array<i64: 2>, scalar_prefetch = 0 : i64, scratch_operands = 2 : i64, tpu.core_type = #tpu.core_type<tc>, window_params = [{transform_indices = @transform_0, window_bounds = array<i64: 8, 32>}, {pipeline_mode = #tpu.pipeline_mode<synchronous>, transform_indices = @transform_1, window_bounds = array<i64: 1, 32>}, {pipeline_mode = #tpu.pipeline_mode<synchronous>, transform_indices = @transform_2, window_bounds = array<i64: 1, 32>}, {pipeline_mode = #tpu.pipeline_mode<synchronous>, transform_indices = @transform_3, window_bounds = array<i64: 1, 32>}, {pipeline_mode = #tpu.pipeline_mode<synchronous>, transform_indices = @transform_4, window_bounds = array<i64: 1, 32>}, {pipeline_mode = #tpu.pipeline_mode<synchronous>, transform_indices = @transform_5, window_bounds = array<i64: 32, 96>}, {pipeline_mode = #tpu.pipeline_mode<synchronous>, transform_indices = @transform_6, window_bounds = array<i64: 1, 96>}, {pipeline_mode = #tpu.pipeline_mode<synchronous>, transform_indices = @transform_7, window_bounds = array<i64: 32, 32>}, {pipeline_mode = #tpu.pipeline_mode<synchronous>, transform_indices = @transform_8, window_bounds = array<i64: 1, 32>}, {pipeline_mode = #tpu.pipeline_mode<synchronous>, transform_indices = @transform_9, window_bounds = array<i64: 32, 128>}, {pipeline_mode = #tpu.pipeline_mode<synchronous>, transform_indices = @transform_10, window_bounds = array<i64: 1, 128>}, {pipeline_mode = #tpu.pipeline_mode<synchronous>, transform_indices = @transform_11, window_bounds = array<i64: 128, 32>}, {pipeline_mode = #tpu.pipeline_mode<synchronous>, transform_indices = @transform_12, window_bounds = array<i64: 1, 32>}, {transform_indices = @transform_13, window_bounds = array<i64: 8, 32>}]} {
    %c0 = arith.constant 0 : index
    %c0_0 = arith.constant 0 : index
    %0 = vector.load %arg2[%c0, %c0_0] : memref<1x32xf32, #tpu.memory_space<vmem>>, vector<1x32xf32>
    %c0_1 = arith.constant 0 : index
    %c0_2 = arith.constant 0 : index
    %1 = vector.load %arg3[%c0_1, %c0_2] : memref<1x32xf32, #tpu.memory_space<vmem>>, vector<1x32xf32>
    %c0_3 = arith.constant 0 : index
    %c0_4 = arith.constant 0 : index
    %2 = vector.load %arg4[%c0_3, %c0_4] : memref<1x32xf32, #tpu.memory_space<vmem>>, vector<1x32xf32>
    %c0_5 = arith.constant 0 : index
    %c0_6 = arith.constant 0 : index
    %3 = vector.load %arg5[%c0_5, %c0_6] : memref<1x32xf32, #tpu.memory_space<vmem>>, vector<1x32xf32>
    %c0_7 = arith.constant 0 : index
    %c0_8 = arith.constant 0 : index
    %4 = vector.load %arg6[%c0_7, %c0_8] : memref<32x96xbf16, #tpu.memory_space<vmem>>, vector<32x96xbf16>
    %c0_9 = arith.constant 0 : index
    %c0_10 = arith.constant 0 : index
    %5 = vector.load %arg7[%c0_9, %c0_10] : memref<1x96xf32, #tpu.memory_space<vmem>>, vector<1x96xf32>
    %c0_11 = arith.constant 0 : index
    %c0_12 = arith.constant 0 : index
    %6 = vector.load %arg8[%c0_11, %c0_12] : memref<32x32xbf16, #tpu.memory_space<vmem>>, vector<32x32xbf16>
    %c0_13 = arith.constant 0 : index
    %c0_14 = arith.constant 0 : index
    %7 = vector.load %arg9[%c0_13, %c0_14] : memref<1x32xf32, #tpu.memory_space<vmem>>, vector<1x32xf32>
    %c0_15 = arith.constant 0 : index
    %c0_16 = arith.constant 0 : index
    %8 = vector.load %arg10[%c0_15, %c0_16] : memref<32x128xbf16, #tpu.memory_space<vmem>>, vector<32x128xbf16>
    %c0_17 = arith.constant 0 : index
    %c0_18 = arith.constant 0 : index
    %9 = vector.load %arg11[%c0_17, %c0_18] : memref<1x128xf32, #tpu.memory_space<vmem>>, vector<1x128xf32>
    %c0_19 = arith.constant 0 : index
    %c0_20 = arith.constant 0 : index
    %10 = vector.load %arg12[%c0_19, %c0_20] : memref<128x32xbf16, #tpu.memory_space<vmem>>, vector<128x32xbf16>
    %c0_21 = arith.constant 0 : index
    %c0_22 = arith.constant 0 : index
    %11 = vector.load %arg13[%c0_21, %c0_22] : memref<1x32xf32, #tpu.memory_space<vmem>>, vector<1x32xf32>
    %c0_23 = arith.constant 0 : index
    %c0_24 = arith.constant 0 : index
    %12 = vector.load %arg1[%c0_23, %c0_24] : memref<8x32xf32, #tpu.memory_space<vmem>>, vector<8x32xf32>
    %cst = arith.constant dense<0.000000e+00> : vector<8xf32>
    %13 = vector.multi_reduction <add>, %12, %cst [1] : vector<8x32xf32> to vector<8xf32>
    %14 = vector.shape_cast %13 : vector<8xf32> to vector<8x1xf32>
    %cst_25 = arith.constant 3.200000e+01 : f32
    %15 = vector.broadcast %cst_25 : f32 to vector<8x1xf32>
    %16 = arith.divf %14, %15 : vector<8x1xf32>
    %17 = vector.broadcast %16 : vector<8x1xf32> to vector<8x32xf32>
    %18 = arith.subf %12, %17 : vector<8x32xf32>
    %19 = arith.mulf %18, %18 : vector<8x32xf32>
    %cst_26 = arith.constant dense<0.000000e+00> : vector<8xf32>
    %20 = vector.multi_reduction <add>, %19, %cst_26 [1] : vector<8x32xf32> to vector<8xf32>
    %21 = vector.shape_cast %20 : vector<8xf32> to vector<8x1xf32>
    %cst_27 = arith.constant 3.200000e+01 : f32
    %22 = vector.broadcast %cst_27 : f32 to vector<8x1xf32>
    %23 = arith.divf %21, %22 : vector<8x1xf32>
    %24 = vector.broadcast %16 : vector<8x1xf32> to vector<8x32xf32>
    %25 = arith.subf %12, %24 : vector<8x32xf32>
    %cst_28 = arith.constant 9.99999974E-6 : f32
    %26 = vector.broadcast %cst_28 : f32 to vector<8x1xf32>
    %27 = arith.addf %23, %26 : vector<8x1xf32>
    %28 = math.rsqrt %27 : vector<8x1xf32>
    %29 = vector.broadcast %28 : vector<8x1xf32> to vector<8x32xf32>
    %30 = arith.mulf %25, %29 : vector<8x32xf32>
    %31 = vector.broadcast %0 : vector<1x32xf32> to vector<8x32xf32>
    %32 = arith.mulf %30, %31 : vector<8x32xf32>
    %33 = vector.broadcast %1 : vector<1x32xf32> to vector<8x32xf32>
    %34 = arith.addf %32, %33 : vector<8x32xf32>
    %35 = arith.truncf %34 : vector<8x32xf32> to vector<8x32xbf16>
    %cst_29 = arith.constant dense<0.000000e+00> : vector<8x96xf32>
    %36 = tpu.matmul %35, %4, %cst_29 {dimension_numbers = #tpu.dot_dimension_numbers<[1], [0], [0], [1], [0, 0, 1, 1], [], []>} : vector<8x32xbf16>, vector<32x96xbf16>, vector<8x96xf32> -> vector<8x96xf32>
    %37 = vector.broadcast %5 : vector<1x96xf32> to vector<8x96xf32>
    %38 = arith.addf %36, %37 : vector<8x96xf32>
    %c0_30 = arith.constant 0 : index
    %c0_31 = arith.constant 0 : index
    %39 = vector.load %arg15[%c0_30, %c0_31] : memref<8x96xf32, #tpu.memory_space<vmem>>, vector<8x96xf32>
    tpu.vector_store %arg15[%c0_30, %c0_31], %38 {strides = array<i32>} : memref<8x96xf32, #tpu.memory_space<vmem>>, vector<8x96xf32>,
    %40 = tpu.iota {dimensions = array<i32: 0>} : vector<8x8xi32>
    %41 = tpu.iota {dimensions = array<i32: 1>} : vector<8x8xi32>
    %42 = arith.cmpi sle, %41, %40 : vector<8x8xi32>
    %c0_i32 = arith.constant 0 : i32
    %c8_i32 = arith.constant 8 : i32
    %43 = arith.muli %c0_i32, %c8_i32 : i32
    %44 = tpu.assume_multiple %43, 8 : i32
    %45 = arith.index_cast %44 : i32 to index
    %c0_32 = arith.constant 0 : index
    %46 = vector.load %arg15[%45, %c0_32] : memref<8x96xf32, #tpu.memory_space<vmem>>, vector<8x8xf32>
    %47 = arith.truncf %46 : vector<8x8xf32> to vector<8x8xbf16>
    %48 = arith.index_cast %44 : i32 to index
    %c32 = arith.constant 32 : index
    %49 = vector.load %arg15[%48, %c32] : memref<8x96xf32, #tpu.memory_space<vmem>>, vector<8x8xf32>
    %50 = arith.truncf %49 : vector<8x8xf32> to vector<8x8xbf16>
    %51 = arith.index_cast %44 : i32 to index
    %c64 = arith.constant 64 : index
    %52 = vector.load %arg15[%51, %c64] : memref<8x96xf32, #tpu.memory_space<vmem>>, vector<8x8xf32>
    %53 = arith.truncf %52 : vector<8x8xf32> to vector<8x8xbf16>
    %cst_33 = arith.constant dense<0.000000e+00> : vector<8x8xf32>
    %54 = tpu.matmul %47, %50, %cst_33 {dimension_numbers = #tpu.dot_dimension_numbers<[1], [1], [0], [0], [0, 0, 1, 0], [], []>} : vector<8x8xbf16>, vector<8x8xbf16>, vector<8x8xf32> -> vector<8x8xf32>
    %cst_34 = arith.constant -1.000000e+30 : f32
    %55 = vector.broadcast %cst_34 : f32 to vector<8x8xf32>
    %56 = arith.select %42, %54, %55 : vector<8x8xi1>, vector<8x8xf32>
    %cst_35 = arith.constant dense<0xFF800000> : vector<8xf32>
    %57 = vector.multi_reduction <maximumf>, %56, %cst_35 [1] : vector<8x8xf32> to vector<8xf32>
    %58 = vector.shape_cast %57 : vector<8xf32> to vector<8x1xf32>
    %59 = vector.broadcast %58 : vector<8x1xf32> to vector<8x8xf32>
    %60 = arith.subf %56, %59 : vector<8x8xf32>
    %61 = math.exp %60 : vector<8x8xf32>
    %cst_36 = arith.constant dense<0.000000e+00> : vector<8xf32>
    %62 = vector.multi_reduction <add>, %61, %cst_36 [1] : vector<8x8xf32> to vector<8xf32>
    %63 = vector.shape_cast %62 : vector<8xf32> to vector<8x1xf32>
    %64 = tpu.reciprocal %63 {approx = true} : vector<8x1xf32> -> vector<8x1xf32>
    %65 = vector.broadcast %64 : vector<8x1xf32> to vector<8x8xf32>
    %66 = arith.mulf %61, %65 : vector<8x8xf32>
    %67 = arith.truncf %66 : vector<8x8xf32> to vector<8x8xbf16>
    %cst_37 = arith.constant dense<0.000000e+00> : vector<8x8xf32>
    %68 = tpu.matmul %67, %53, %cst_37 {dimension_numbers = #tpu.dot_dimension_numbers<[1], [0], [0], [1], [0, 0, 1, 1], [], []>} : vector<8x8xbf16>, vector<8x8xbf16>, vector<8x8xf32> -> vector<8x8xf32>
    %69 = arith.index_cast %44 : i32 to index
    %c0_38 = arith.constant 0 : index
    %70 = vector.load %arg16[%69, %c0_38] : memref<8x32xf32, #tpu.memory_space<vmem>>, vector<8x8xf32>
    tpu.vector_store %arg16[%69, %c0_38], %68 {strides = array<i32>} : memref<8x32xf32, #tpu.memory_space<vmem>>, vector<8x8xf32>,
    %71 = arith.index_cast %44 : i32 to index
    %c8 = arith.constant 8 : index
    %72 = vector.load %arg15[%71, %c8] : memref<8x96xf32, #tpu.memory_space<vmem>>, vector<8x8xf32>
    %73 = arith.truncf %72 : vector<8x8xf32> to vector<8x8xbf16>
    %74 = arith.index_cast %44 : i32 to index
    %c40 = arith.constant 40 : index
    %75 = vector.load %arg15[%74, %c40] : memref<8x96xf32, #tpu.memory_space<vmem>>, vector<8x8xf32>
    %76 = arith.truncf %75 : vector<8x8xf32> to vector<8x8xbf16>
    %77 = arith.index_cast %44 : i32 to index
    %c72 = arith.constant 72 : index
    %78 = vector.load %arg15[%77, %c72] : memref<8x96xf32, #tpu.memory_space<vmem>>, vector<8x8xf32>
    %79 = arith.truncf %78 : vector<8x8xf32> to vector<8x8xbf16>
    %cst_39 = arith.constant dense<0.000000e+00> : vector<8x8xf32>
    %80 = tpu.matmul %73, %76, %cst_39 {dimension_numbers = #tpu.dot_dimension_numbers<[1], [1], [0], [0], [0, 0, 1, 0], [], []>} : vector<8x8xbf16>, vector<8x8xbf16>, vector<8x8xf32> -> vector<8x8xf32>
    %cst_40 = arith.constant -1.000000e+30 : f32
    %81 = vector.broadcast %cst_40 : f32 to vector<8x8xf32>
    %82 = arith.select %42, %80, %81 : vector<8x8xi1>, vector<8x8xf32>
    %cst_41 = arith.constant dense<0xFF800000> : vector<8xf32>
    %83 = vector.multi_reduction <maximumf>, %82, %cst_41 [1] : vector<8x8xf32> to vector<8xf32>
    %84 = vector.shape_cast %83 : vector<8xf32> to vector<8x1xf32>
    %85 = vector.broadcast %84 : vector<8x1xf32> to vector<8x8xf32>
    %86 = arith.subf %82, %85 : vector<8x8xf32>
    %87 = math.exp %86 : vector<8x8xf32>
    %cst_42 = arith.constant dense<0.000000e+00> : vector<8xf32>
    %88 = vector.multi_reduction <add>, %87, %cst_42 [1] : vector<8x8xf32> to vector<8xf32>
    %89 = vector.shape_cast %88 : vector<8xf32> to vector<8x1xf32>
    %90 = tpu.reciprocal %89 {approx = true} : vector<8x1xf32> -> vector<8x1xf32>
    %91 = vector.broadcast %90 : vector<8x1xf32> to vector<8x8xf32>
    %92 = arith.mulf %87, %91 : vector<8x8xf32>
    %93 = arith.truncf %92 : vector<8x8xf32> to vector<8x8xbf16>
    %cst_43 = arith.constant dense<0.000000e+00> : vector<8x8xf32>
    %94 = tpu.matmul %93, %79, %cst_43 {dimension_numbers = #tpu.dot_dimension_numbers<[1], [0], [0], [1], [0, 0, 1, 1], [], []>} : vector<8x8xbf16>, vector<8x8xbf16>, vector<8x8xf32> -> vector<8x8xf32>
    %95 = arith.index_cast %44 : i32 to index
    %c8_44 = arith.constant 8 : index
    %96 = vector.load %arg16[%95, %c8_44] : memref<8x32xf32, #tpu.memory_space<vmem>>, vector<8x8xf32>
    tpu.vector_store %arg16[%95, %c8_44], %94 {strides = array<i32>} : memref<8x32xf32, #tpu.memory_space<vmem>>, vector<8x8xf32>,
    %97 = arith.index_cast %44 : i32 to index
    %c16 = arith.constant 16 : index
    %98 = vector.load %arg15[%97, %c16] : memref<8x96xf32, #tpu.memory_space<vmem>>, vector<8x8xf32>
    %99 = arith.truncf %98 : vector<8x8xf32> to vector<8x8xbf16>
    %100 = arith.index_cast %44 : i32 to index
    %c48 = arith.constant 48 : index
    %101 = vector.load %arg15[%100, %c48] : memref<8x96xf32, #tpu.memory_space<vmem>>, vector<8x8xf32>
    %102 = arith.truncf %101 : vector<8x8xf32> to vector<8x8xbf16>
    %103 = arith.index_cast %44 : i32 to index
    %c80 = arith.constant 80 : index
    %104 = vector.load %arg15[%103, %c80] : memref<8x96xf32, #tpu.memory_space<vmem>>, vector<8x8xf32>
    %105 = arith.truncf %104 : vector<8x8xf32> to vector<8x8xbf16>
    %cst_45 = arith.constant dense<0.000000e+00> : vector<8x8xf32>
    %106 = tpu.matmul %99, %102, %cst_45 {dimension_numbers = #tpu.dot_dimension_numbers<[1], [1], [0], [0], [0, 0, 1, 0], [], []>} : vector<8x8xbf16>, vector<8x8xbf16>, vector<8x8xf32> -> vector<8x8xf32>
    %cst_46 = arith.constant -1.000000e+30 : f32
    %107 = vector.broadcast %cst_46 : f32 to vector<8x8xf32>
    %108 = arith.select %42, %106, %107 : vector<8x8xi1>, vector<8x8xf32>
    %cst_47 = arith.constant dense<0xFF800000> : vector<8xf32>
    %109 = vector.multi_reduction <maximumf>, %108, %cst_47 [1] : vector<8x8xf32> to vector<8xf32>
    %110 = vector.shape_cast %109 : vector<8xf32> to vector<8x1xf32>
    %111 = vector.broadcast %110 : vector<8x1xf32> to vector<8x8xf32>
    %112 = arith.subf %108, %111 : vector<8x8xf32>
    %113 = math.exp %112 : vector<8x8xf32>
    %cst_48 = arith.constant dense<0.000000e+00> : vector<8xf32>
    %114 = vector.multi_reduction <add>, %113, %cst_48 [1] : vector<8x8xf32> to vector<8xf32>
    %115 = vector.shape_cast %114 : vector<8xf32> to vector<8x1xf32>
    %116 = tpu.reciprocal %115 {approx = true} : vector<8x1xf32> -> vector<8x1xf32>
    %117 = vector.broadcast %116 : vector<8x1xf32> to vector<8x8xf32>
    %118 = arith.mulf %113, %117 : vector<8x8xf32>
    %119 = arith.truncf %118 : vector<8x8xf32> to vector<8x8xbf16>
    %cst_49 = arith.constant dense<0.000000e+00> : vector<8x8xf32>
    %120 = tpu.matmul %119, %105, %cst_49 {dimension_numbers = #tpu.dot_dimension_numbers<[1], [0], [0], [1], [0, 0, 1, 1], [], []>} : vector<8x8xbf16>, vector<8x8xbf16>, vector<8x8xf32> -> vector<8x8xf32>
    %121 = arith.index_cast %44 : i32 to index
    %c16_50 = arith.constant 16 : index
    %122 = vector.load %arg16[%121, %c16_50] : memref<8x32xf32, #tpu.memory_space<vmem>>, vector<8x8xf32>
    tpu.vector_store %arg16[%121, %c16_50], %120 {strides = array<i32>} : memref<8x32xf32, #tpu.memory_space<vmem>>, vector<8x8xf32>,
    %123 = arith.index_cast %44 : i32 to index
    %c24 = arith.constant 24 : index
    %124 = vector.load %arg15[%123, %c24] : memref<8x96xf32, #tpu.memory_space<vmem>>, vector<8x8xf32>
    %125 = arith.truncf %124 : vector<8x8xf32> to vector<8x8xbf16>
    %126 = arith.index_cast %44 : i32 to index
    %c56 = arith.constant 56 : index
    %127 = vector.load %arg15[%126, %c56] : memref<8x96xf32, #tpu.memory_space<vmem>>, vector<8x8xf32>
    %128 = arith.truncf %127 : vector<8x8xf32> to vector<8x8xbf16>
    %129 = arith.index_cast %44 : i32 to index
    %c88 = arith.constant 88 : index
    %130 = vector.load %arg15[%129, %c88] : memref<8x96xf32, #tpu.memory_space<vmem>>, vector<8x8xf32>
    %131 = arith.truncf %130 : vector<8x8xf32> to vector<8x8xbf16>
    %cst_51 = arith.constant dense<0.000000e+00> : vector<8x8xf32>
    %132 = tpu.matmul %125, %128, %cst_51 {dimension_numbers = #tpu.dot_dimension_numbers<[1], [1], [0], [0], [0, 0, 1, 0], [], []>} : vector<8x8xbf16>, vector<8x8xbf16>, vector<8x8xf32> -> vector<8x8xf32>
    %cst_52 = arith.constant -1.000000e+30 : f32
    %133 = vector.broadcast %cst_52 : f32 to vector<8x8xf32>
    %134 = arith.select %42, %132, %133 : vector<8x8xi1>, vector<8x8xf32>
    %cst_53 = arith.constant dense<0xFF800000> : vector<8xf32>
    %135 = vector.multi_reduction <maximumf>, %134, %cst_53 [1] : vector<8x8xf32> to vector<8xf32>
    %136 = vector.shape_cast %135 : vector<8xf32> to vector<8x1xf32>
    %137 = vector.broadcast %136 : vector<8x1xf32> to vector<8x8xf32>
    %138 = arith.subf %134, %137 : vector<8x8xf32>
    %139 = math.exp %138 : vector<8x8xf32>
    %cst_54 = arith.constant dense<0.000000e+00> : vector<8xf32>
    %140 = vector.multi_reduction <add>, %139, %cst_54 [1] : vector<8x8xf32> to vector<8xf32>
    %141 = vector.shape_cast %140 : vector<8xf32> to vector<8x1xf32>
    %142 = tpu.reciprocal %141 {approx = true} : vector<8x1xf32> -> vector<8x1xf32>
    %143 = vector.broadcast %142 : vector<8x1xf32> to vector<8x8xf32>
    %144 = arith.mulf %139, %143 : vector<8x8xf32>
    %145 = arith.truncf %144 : vector<8x8xf32> to vector<8x8xbf16>
    %cst_55 = arith.constant dense<0.000000e+00> : vector<8x8xf32>
    %146 = tpu.matmul %145, %131, %cst_55 {dimension_numbers = #tpu.dot_dimension_numbers<[1], [0], [0], [1], [0, 0, 1, 1], [], []>} : vector<8x8xbf16>, vector<8x8xbf16>, vector<8x8xf32> -> vector<8x8xf32>
    %147 = arith.index_cast %44 : i32 to index
    %c24_56 = arith.constant 24 : index
    %148 = vector.load %arg16[%147, %c24_56] : memref<8x32xf32, #tpu.memory_space<vmem>>, vector<8x8xf32>
    tpu.vector_store %arg16[%147, %c24_56], %146 {strides = array<i32>} : memref<8x32xf32, #tpu.memory_space<vmem>>, vector<8x8xf32>,
    %c1_i32 = arith.constant 1 : i32
    %c0_57 = arith.constant 0 : index
    %c0_58 = arith.constant 0 : index
    %149 = vector.load %arg16[%c0_57, %c0_58] : memref<8x32xf32, #tpu.memory_space<vmem>>, vector<8x32xf32>
    %150 = arith.truncf %149 : vector<8x32xf32> to vector<8x32xbf16>
    %cst_59 = arith.constant dense<0.000000e+00> : vector<8x32xf32>
    %151 = tpu.matmul %150, %6, %cst_59 {dimension_numbers = #tpu.dot_dimension_numbers<[1], [0], [0], [1], [0, 0, 1, 1], [], []>} : vector<8x32xbf16>, vector<32x32xbf16>, vector<8x32xf32> -> vector<8x32xf32>
    %152 = vector.broadcast %7 : vector<1x32xf32> to vector<8x32xf32>
    %153 = arith.addf %151, %152 : vector<8x32xf32>
    %154 = arith.addf %34, %153 : vector<8x32xf32>
    %cst_60 = arith.constant dense<0.000000e+00> : vector<8xf32>
    %155 = vector.multi_reduction <add>, %154, %cst_60 [1] : vector<8x32xf32> to vector<8xf32>
    %156 = vector.shape_cast %155 : vector<8xf32> to vector<8x1xf32>
    %cst_61 = arith.constant 3.200000e+01 : f32
    %157 = vector.broadcast %cst_61 : f32 to vector<8x1xf32>
    %158 = arith.divf %156, %157 : vector<8x1xf32>
    %159 = vector.broadcast %158 : vector<8x1xf32> to vector<8x32xf32>
    %160 = arith.subf %154, %159 : vector<8x32xf32>
    %161 = arith.mulf %160, %160 : vector<8x32xf32>
    %cst_62 = arith.constant dense<0.000000e+00> : vector<8xf32>
    %162 = vector.multi_reduction <add>, %161, %cst_62 [1] : vector<8x32xf32> to vector<8xf32>
    %163 = vector.shape_cast %162 : vector<8xf32> to vector<8x1xf32>
    %cst_63 = arith.constant 3.200000e+01 : f32
    %164 = vector.broadcast %cst_63 : f32 to vector<8x1xf32>
    %165 = arith.divf %163, %164 : vector<8x1xf32>
    %166 = vector.broadcast %158 : vector<8x1xf32> to vector<8x32xf32>
    %167 = arith.subf %154, %166 : vector<8x32xf32>
    %cst_64 = arith.constant 9.99999974E-6 : f32
    %168 = vector.broadcast %cst_64 : f32 to vector<8x1xf32>
    %169 = arith.addf %165, %168 : vector<8x1xf32>
    %170 = math.rsqrt %169 : vector<8x1xf32>
    %171 = vector.broadcast %170 : vector<8x1xf32> to vector<8x32xf32>
    %172 = arith.mulf %167, %171 : vector<8x32xf32>
    %173 = vector.broadcast %2 : vector<1x32xf32> to vector<8x32xf32>
    %174 = arith.mulf %172, %173 : vector<8x32xf32>
    %175 = vector.broadcast %3 : vector<1x32xf32> to vector<8x32xf32>
    %176 = arith.addf %174, %175 : vector<8x32xf32>
    %177 = arith.truncf %176 : vector<8x32xf32> to vector<8x32xbf16>
    %cst_65 = arith.constant dense<0.000000e+00> : vector<8x128xf32>
    %178 = tpu.matmul %177, %8, %cst_65 {dimension_numbers = #tpu.dot_dimension_numbers<[1], [0], [0], [1], [0, 0, 1, 1], [], []>} : vector<8x32xbf16>, vector<32x128xbf16>, vector<8x128xf32> -> vector<8x128xf32>
    %179 = vector.broadcast %9 : vector<1x128xf32> to vector<8x128xf32>
    %180 = arith.addf %178, %179 : vector<8x128xf32>
    %181 = arith.mulf %180, %180 : vector<8x128xf32>
    %182 = arith.mulf %180, %181 : vector<8x128xf32>
    %cst_66 = arith.constant 4.471500e-02 : f32
    %183 = vector.broadcast %cst_66 : f32 to vector<8x128xf32>
    %184 = arith.mulf %183, %182 : vector<8x128xf32>
    %185 = arith.addf %180, %184 : vector<8x128xf32>
    %cst_67 = arith.constant 0.797884583 : f32
    %186 = vector.broadcast %cst_67 : f32 to vector<8x128xf32>
    %187 = arith.mulf %186, %185 : vector<8x128xf32>
    %188 = math.tanh %187 : vector<8x128xf32>
    %cst_68 = arith.constant 1.000000e+00 : f32
    %189 = vector.broadcast %cst_68 : f32 to vector<8x128xf32>
    %190 = arith.addf %189, %188 : vector<8x128xf32>
    %cst_69 = arith.constant 5.000000e-01 : f32
    %191 = vector.broadcast %cst_69 : f32 to vector<8x128xf32>
    %192 = arith.mulf %191, %190 : vector<8x128xf32>
    %193 = arith.mulf %180, %192 : vector<8x128xf32>
    %194 = arith.truncf %193 : vector<8x128xf32> to vector<8x128xbf16>
    %cst_70 = arith.constant dense<0.000000e+00> : vector<8x32xf32>
    %195 = tpu.matmul %194, %10, %cst_70 {dimension_numbers = #tpu.dot_dimension_numbers<[1], [0], [0], [1], [0, 0, 1, 1], [], []>} : vector<8x128xbf16>, vector<128x32xbf16>, vector<8x32xf32> -> vector<8x32xf32>
    %196 = vector.broadcast %11 : vector<1x32xf32> to vector<8x32xf32>
    %197 = arith.addf %195, %196 : vector<8x32xf32>
    %198 = arith.addf %154, %197 : vector<8x32xf32>
    %c0_71 = arith.constant 0 : index
    %c0_72 = arith.constant 0 : index
    %199 = vector.load %arg14[%c0_71, %c0_72] : memref<8x32xf32, #tpu.memory_space<vmem>>, vector<8x32xf32>
    tpu.vector_store %arg14[%c0_71, %c0_72], %198 {strides = array<i32>} : memref<8x32xf32, #tpu.memory_space<vmem>>, vector<8x32xf32>,
    return
  }
  func.func @transform_0(%arg0: i32) -> (i32, i32) {
    %c0_i32 = arith.constant 0 : i32
    %c0_i32_0 = arith.constant 0 : i32
    return %arg0, %c0_i32 : i32, i32
  }
  func.func @transform_1(%arg0: i32) -> (i32, i32) {
    %c0_i32 = arith.constant 0 : i32
    %c0_i32_0 = arith.constant 0 : i32
    %c0_i32_1 = arith.constant 0 : i32
    return %c0_i32, %c0_i32_0 : i32, i32
  }
  func.func @transform_2(%arg0: i32) -> (i32, i32) {
    %c0_i32 = arith.constant 0 : i32
    %c0_i32_0 = arith.constant 0 : i32
    %c0_i32_1 = arith.constant 0 : i32
    return %c0_i32, %c0_i32_0 : i32, i32
  }
  func.func @transform_3(%arg0: i32) -> (i32, i32) {
    %c0_i32 = arith.constant 0 : i32
    %c0_i32_0 = arith.constant 0 : i32
    %c0_i32_1 = arith.constant 0 : i32
    return %c0_i32, %c0_i32_0 : i32, i32
  }
  func.func @transform_4(%arg0: i32) -> (i32, i32) {
    %c0_i32 = arith.constant 0 : i32
    %c0_i32_0 = arith.constant 0 : i32
    %c0_i32_1 = arith.constant 0 : i32
    return %c0_i32, %c0_i32_0 : i32, i32
  }
  func.func @transform_5(%arg0: i32) -> (i32, i32) {
    %c0_i32 = arith.constant 0 : i32
    %c0_i32_0 = arith.constant 0 : i32
    %c0_i32_1 = arith.constant 0 : i32
    return %c0_i32, %c0_i32_0 : i32, i32
  }
  func.func @transform_6(%arg0: i32) -> (i32, i32) {
    %c0_i32 = arith.constant 0 : i32
    %c0_i32_0 = arith.constant 0 : i32
    %c0_i32_1 = arith.constant 0 : i32
    return %c0_i32, %c0_i32_0 : i32, i32
  }
  func.func @transform_7(%arg0: i32) -> (i32, i32) {
    %c0_i32 = arith.constant 0 : i32
    %c0_i32_0 = arith.constant 0 : i32
    %c0_i32_1 = arith.constant 0 : i32
    return %c0_i32, %c0_i32_0 : i32, i32
  }
  func.func @transform_8(%arg0: i32) -> (i32, i32) {
    %c0_i32 = arith.constant 0 : i32
    %c0_i32_0 = arith.constant 0 : i32
    %c0_i32_1 = arith.constant 0 : i32
    return %c0_i32, %c0_i32_0 : i32, i32
  }
  func.func @transform_9(%arg0: i32) -> (i32, i32) {
    %c0_i32 = arith.constant 0 : i32
    %c0_i32_0 = arith.constant 0 : i32
    %c0_i32_1 = arith.constant 0 : i32
    return %c0_i32, %c0_i32_0 : i32, i32
  }
  func.func @transform_10(%arg0: i32) -> (i32, i32) {
    %c0_i32 = arith.constant 0 : i32
    %c0_i32_0 = arith.constant 0 : i32
    %c0_i32_1 = arith.constant 0 : i32
    return %c0_i32, %c0_i32_0 : i32, i32
  }
  func.func @transform_11(%arg0: i32) -> (i32, i32) {
    %c0_i32 = arith.constant 0 : i32
    %c0_i32_0 = arith.constant 0 : i32
    %c0_i32_1 = arith.constant 0 : i32
    return %c0_i32, %c0_i32_0 : i32, i32
  }
  func.func @transform_12(%arg0: i32) -> (i32, i32) {
    %c0_i32 = arith.constant 0 : i32
    %c0_i32_0 = arith.constant 0 : i32
    %c0_i32_1 = arith.constant 0 : i32
    return %c0_i32, %c0_i32_0 : i32, i32
  }
  func.func @transform_13(%arg0: i32) -> (i32, i32) {
    %c0_i32 = arith.constant 0 : i32
    %c0_i32_0 = arith.constant 0 : i32
    return %arg0, %c0_i32 : i32, i32
  }
}

</mosaic_0001>

<bundles_post_ra>
// kernel: tpu_custom_call.1
= control target key start
LH: loop header
LB: loop body
LE: loop exit
PB: predicated region body
PF: predicated region fallthrough
CT: control target
= control target key end

     0   :  { %s1601_s0 = inlined_call_operand.vmem [shape: f32[16,32], index: 0, kind: input, shape index: {}]   ;;  %s1602_s1 = inlined_call_operand.vmem [shape: f32[1,32], index: 1, kind: input, shape index: {}]   ;;  %s1603_s2 = inlined_call_operand.vmem [shape: f32[1,32], index: 2, kind: input, shape index: {}]   ;;  %s1604_s3 = inlined_call_operand.vmem [shape: f32[1,32], index: 3, kind: input, shape index: {}]   ;;  %s1605_s4 = inlined_call_operand.vmem [shape: f32[1,32], index: 4, kind: input, shape index: {}]   ;;  %s1606_s5 = inlined_call_operand.vmem [shape: bf16[32,96], index: 5, kind: input, shape index: {}]   ;;  %s1607_s6 = inlined_call_operand.vmem [shape: f32[1,96], index: 6, kind: input, shape index: {}]   ;;  %s1608_s7 = inlined_call_operand.vmem [shape: bf16[32,32], index: 7, kind: input, shape index: {}]   ;;  %s1609_s8 = inlined_call_operand.vmem [shape: f32[1,32], index: 8, kind: input, shape index: {}]   ;;  %s1610_s9 = inlined_call_operand.vmem [shape: bf16[32,128], index: 9, kind: input, shape index: {}]   ;;  %s1611_s10 = inlined_call_operand.vmem [shape: f32[1,128], index: 10, kind: input, shape index: {}]   ;;  %s1612_s11 = inlined_call_operand.vmem [shape: bf16[128,32], index: 11, kind: input, shape index: {}]   ;;  %s1613_s12 = inlined_call_operand.vmem [shape: f32[1,32], index: 12, kind: input, shape index: {}]   ;;  %s1614_s13 = inlined_call_operand.hbm [shape: f32[16,32], index: 13, kind: output, shape index: {}]  }
   0x1   :  { %1615 = sst [smem:[#allocation7_spill]] %s1601_s0 }
   0x2   :  { %1616 = sst [smem:[#allocation8_spill]] %s1602_s1 }
   0x3   :  { %1617 = sst [smem:[#allocation9_spill]] %s1603_s2 }
   0x4   :  { %1618 = sst [smem:[#allocation10_spill]] %s1604_s3 }
   0x5   :  { %18 = vsyncpa [#allocation5], 0 }
   0x6   :  { %20 = vsyncpa [#allocation5 + $0x1], 0  ;;  %s1383_s25 = smov 0   ;;  %s1385_s26 = smov 0  }
   0x7   :  { %s1387_s27 = smov 0   ;;  %s1389_s28 = smov 0  }
   0x8 LB: > { %s1404_s29 = sadd.s32 4294967295, %s1296_s28   ;;  %s1057_s30 = sadd.s32 4294967294, %s1296_s28   ;;  %s1296_s28 = sphi %s1389_s28, %s1628_s28   ;;  %s1292_s27 = sphi %s1387_s27, %s1627_s27   ;;  %s1288_s26 = sphi %s1385_s26, %s1626_s26   ;;  %s1284_s25 = sphi %s1383_s25, %s1625_s25  }
   0x9   : > { %s1408_s14 = sadd.s32 1, %s1296_s28   ;;  %s311_s15 = sadd.s32 1, %s1292_s27 }
   0xa   : > { %s308_s16 = ssub.s32 %s1296_s28, %s1408_s14  ;;  %p321_p0 = scmp.ne.s32.totalorder %s1292_s27, %s1288_s26 }
   0xb   : > { %p309_p1 = scmp.eq.s32.totalorder %s308_s16, 0  ;;  %p322_p2 = scmp.eq.s32.totalorder %s1404_s29, 1 }
   0xc   : > { %p327_p3 = scmp.ne.s32.totalorder %s1288_s26, %s1284_s25  ;;  %p328_p4 = scmp.eq.s32.totalorder %s1057_s30, 1 }
   0xd   : > { %s1419_s17 = scalar_select %p309_p1, %s1292_s27, %s311_s15  }
   0xe   : > { %p1421_p5 = por %p322_p2, %p321_p0  ;;  %p1425_p6 = por %p328_p4, %p327_p3 }
   0xf   : > { %p1060_p7 = scmp.ge.s32.totalorder %s1296_s28, 1  ;;  %p389_p8 = scmp.lt.s32.totalorder %s1296_s28, 3 }
  0x11   : > { %p390_p9 = pnand %p1060_p7, %p389_p8 }
  0x12   : > { %p432_p10 = scmp.lt.s32.totalorder (!%p390_p9), %s1404_s29, 1  ;;  %s1621_s0 = sld [smem:[#allocation7_spill]] (!%p390_p9) }
  0x13   : > { %393 = sbr.rel (%p390_p9) target bundleno = 2342 (0x926), region = 72  ;;  %s1622_s1 = sld [smem:[#allocation8_spill]] (!%p390_p9) }
  0x14   : > { %s1623_s2 = sld [smem:[#allocation9_spill]] (!%p390_p9)  ;;  %s1299_s16 = smov (!%p390_p9), 88  }
  0x15   : > { %s1302_s22 = smov (!%p390_p9), 72   ;;  %s1303_s23 = smov (!%p390_p9), 80  }
  0x16   : > { %s1305_s30 = smov (!%p390_p9), 104   ;;  %s1306_s15 = smov (!%p390_p9), 112  }
  0x17   : > { %s1624_s3 = sld [smem:[#allocation10_spill]] (!%p390_p9) }
  0x18   : > { %s433_s20 = scalar_select %p432_p10, %s1404_s29, 1  ;;  %vm474_vm0 = vcmask 261120   ;;  %v1298_v2 = vmov 32.0   ;;  %v1135_v14 = vld [vmem:[%s1606_s5 + $0x8] sm:$0xff]  ;;  %v1134_v15 = vld [vmem:[%s1606_s5] sm:$0xff]  ;;  %vm544_vm5 = vcmask 785408   ;;  %v546_v48 = vlaneseq }
  0x19   : > { %1210 = vrcp.f32 %v1298_v2  ;;  %537 = vmatpush.bf16.msra.mxu0 %v1135_v14  ;;  %v1202_v25 = vld [vmem:[%s1622_s1] ss:$0 sm:$0xff]  ;;  %vm594_vm6 = vcmask 1043456   ;;  %vm556_vm7 = vcmask 64512   ;;  %vm676_vm9 = vcmask 130112  }
  0x1a   : > { %s1062_s21 = sshll.u32 %s433_s20, 3  ;;  %v1203_v28 = vld [vmem:[%s1623_s2] ss:$0 sm:$0xff]  ;;  %s1300_s20 = smov 64   ;;  %v547_v49 = vshrl.u32 %v546_v48, 7  ;;  %v549_v50 = vand.u32 127, %v546_v48 }
  0x1b   : > { %s435_s24 = scalar_lea.vmem %s1621_s0, %s1062_s21  ;;  %v1204_v32 = vld [vmem:[%s1607_s6] ss:$0 sm:$0xff]  ;;  %s1301_s21 = smov 96   ;;  %vm742_vm10 = vcmask 195712   ;;  %vm808_vm11 = vcmask 261312  }
  0x1c   : > { %v473_v0 = vld [vmem:[%s435_s24] sm:$0xff]  ;;  %vm550_vm8 = vcmp.le.s32.totalorder %v549_v50, %v547_v49  ;;  %s1304_s24 = smov 120   ;;  %s429_s0 = sand.u32 1, %s1288_s26  }
  0x1d   : > { %v475_v1 = vsel %vm474_vm0, %v473_v0, 0.0  ;;  %538 = vmatpush.bf16.msra.mxu0 %v1134_v15  ;;  %s1061_s1 = sshll.u32 %s429_s0, 3 }
  0x1e   : > { %476 = vadd.xlane.f32.xlu0 %v475_v1 }
  0x1f   : > { %v1211_v3 = vpop.eup %1210 }
  0x20   : > { %v479_v4 = vmul.f32 32.0, %v1211_v3  ;;  %vm483_vm1 = vweird.f32 %v1211_v3 }
  0x22   : > { %v480_v5 = vsub.f32 1.0, %v479_v4 }
  0x24   : > { %v481_v6 = vmul.f32 %v1211_v3, %v480_v5 }
  0x26   : > { %v482_v7 = vadd.f32 %v1211_v3, %v481_v6 }
  0x28   : > { %v1437_v8 = vsel %vm483_vm1, %v1211_v3, %v482_v7 }
  0x91   : > { %v477_v9 = vpop.xlane.xlu0 %476 }
  0x92   : > { %v485_v10 = vmul.f32 %v1437_v8, %v477_v9 }
  0x94   : > { %v486_v11 = vsub.f32 %v473_v0, %v485_v10 }
  0x96   : > { %v487_v12 = vmul.f32 %v486_v11, %v486_v11 }
  0x98   : > { %v488_v13 = vsel %vm474_vm0, %v487_v12, 0.0 }
  0x99   : > { %489 = vadd.xlane.f32.xlu0 %v488_v13 }
 0x10c   : > { %v490_v16 = vpop.xlane.xlu0 %489 }
 0x10d   : > { %v491_v17 = vmul.f32 %v490_v16, %v1437_v8 }
 0x10f   : > { %v492_v18 = vadd.f32 1e-05, %v491_v17 }
 0x111   : > { %1212 = vrsqrt.f32 %v492_v18  ;;  %vm499_vm3 = vweird.f32 %v492_v18 }
 0x117   : > { %v1213_v19 = vpop.eup %1212 }
 0x118   : > { %v494_v20 = vmul.f32 %v1213_v19, %v492_v18  ;;  %vm500_vm2 = vweird.f32 %v1213_v19 }
 0x119   : > { %vm501_vm4 = vmor %vm499_vm3, %vm500_vm2 }
 0x11a   : > { %v495_v21 = vmul.f32 %v1213_v19, %v494_v20 }
 0x11c   : > { %v496_v22 = vmul.f32 0.5, %v495_v21 }
 0x11e   : > { %v497_v23 = vsub.f32 1.5, %v496_v22 }
 0x120   : > { %v498_v24 = vmul.f32 %v1213_v19, %v497_v23 }
 0x122   : > { %v502_v26 = vsel %vm501_vm4, %v1213_v19, %v498_v24 }
 0x123   : > { %v503_v27 = vmul.f32 %v502_v26, %v486_v11 }
 0x125   : > { %v507_v29 = vmul.f32 %v1202_v25, %v503_v27 }
 0x127   : > { %v1454_v30 = vadd.f32 %v1203_v28, %v507_v29 }
 0x129   : > { %v512_v31 = vpack.c.bf16 %v1454_v30, %v1454_v30 }
 0x12b   : > { %1071 = vmatmul.msk.bf16.vlgmr.msra.gmra.mxu0 %vm474_vm0, %v512_v31 }
 0x1a8   : > { %v540_v33 = vpop.f32.mrf.mxu0 }
 0x1a9   : > { %v541_v34 = vadd.f32 %v1204_v32, %v540_v33 }
 0x1ab   : > { %545 = vst.msk [vmem:[#allocation2] sm:$0xff] %vm544_vm5, %v541_v34 }
 0x1b0   : > { %v542_v35 = vpop.f32.mrf.mxu0 }
 0x1b2   : > { %v612_v36 = vld [vmem:[#allocation2] sm:$0xff] }
 0x1b3   : > { %v1462_v37 = vpack.c.bf16 %v612_v36, %v612_v36 }
 0x1b5   : > { %617 = vrot.lane.b32.xlu0 %v1462_v37, %s1299_s16  ;;  %589 = vrot.lane.b32.xlu2 %v1462_v37, %s1300_s20  ;;  %s1307_s16 = smov 40   ;;  %s1308_s20 = smov 48  }
 0x1b6   : > { %554 = vrot.lane.b32.xlu1 %v1462_v37, %s1301_s21  ;;  %s1309_s21 = smov 56  }
 0x1bd   : > { %749 = vrot.lane.b32.xlu0 %v1462_v37, %s1302_s22  ;;  %s1310_s22 = smov 16  }
 0x1c5   : > { %683 = vrot.lane.b32.xlu0 %v1462_v37, %s1303_s23  ;;  %s1311_s23 = smov 8  }
 0x20f   : > { %v590_v38 = vpop.permute.xlu2 %589 }
 0x210   : > { %v596_v39 = vsel %vm594_vm6, %v590_v38, 0 }
 0x211   : > { %605 = vmatpush.bf16.msra.mxu2 %v596_v39 }
 0x227   : > { %v618_v40 = vpop.permute.xlu0 %617 }
 0x228   : > { %v555_v41 = vpop.permute.xlu1 %554  ;;  %v623_v42 = vsel %vm556_vm7, %v618_v40, 0 }
 0x229   : > { %v561_v43 = vsel %vm556_vm7, %v555_v41, 0  ;;  %632 = vmatpush.bf16.xpose.msrb.mxu2 %v623_v42 }
 0x22a   : > { %570 = vmatpush.bf16.xpose.msra.mxu1 %v561_v43 }
 0x22f   : > { %v750_v44 = vpop.permute.xlu0 %749 }
 0x230   : > { %v755_v45 = vsel %vm556_vm7, %v750_v44, 0 }
 0x231   : > { %1072 = vmatmul.msk.bf16.vlgmr.msra.gmra.mxu1 %vm556_vm7, %v1462_v37  ;;  %764 = vmatpush.bf16.xpose.msra.mxu3 %v755_v45 }
 0x237   : > { %v684_v46 = vpop.permute.xlu0 %683 }
 0x238   : > { %v689_v47 = vsel %vm556_vm7, %v684_v46, 0 }
 0x239   : > { %698 = vmatpush.bf16.xpose.msrb.mxu0 %v689_v47 }
 0x2ae   : > { %v572_v51 = vpop.f32.mrf.mxu1 }
 0x2af   : > { %v576_v52 = vsel %vm550_vm8, %v572_v51, -1e+30 }
 0x2b0   : > { %v577_v53 = vsel %vm556_vm7, %v576_v52, -inf }
 0x2b1   : > { %578 = vmax.xlane.f32.xlu1 %v577_v53 }
 0x2b6   : > { %v574_v54 = vpop.f32.mrf.mxu1 }
 0x324   : > { %v579_v55 = vpop.xlane.xlu1 %578 }
 0x325   : > { %v580_v56 = vsub.f32 %v576_v52, %v579_v55 }
 0x327   : > { %v581_v57 = vmul.f32 1.442695, %v580_v56 }
 0x329   : > { %1214 = vpow2.f32 %v581_v57 }
 0x32f   : > { %v1215_v58 = vpop.eup %1214 }
 0x330   : > { %v583_v59 = vsel %vm556_vm7, %v1215_v58, 0.0 }
 0x331   : > { %584 = vadd.xlane.f32.xlu2 %v583_v59 }
 0x349   : > { %615 = vrot.lane.b32.xlu2 %v1462_v37, %s1304_s24  ;;  %s1312_s24 = smov 24  }
 0x351   : > { %747 = vrot.lane.b32.xlu2 %v1462_v37, %s1305_s30 }
 0x359   : > { %681 = vrot.lane.b32.xlu2 %v1462_v37, %s1306_s15 }
 0x3a4   : > { %v585_v60 = vpop.xlane.xlu2 %584 }
 0x3a5   : > { %1216 = vrcp.f32 %v585_v60 }
 0x3ab   : > { %v1217_v61 = vpop.eup %1216 }
 0x3ac   : > { %v616_v62 = vpop.permute.xlu2 %615  ;;  %v587_v63 = vmul.f32 %v1217_v61, %v1215_v58  ;;  %v1137_v58 = vld [vmem:[%s1608_s7 + $0x8] sm:$0xff]  ;;  %v1136_v61 = vld [vmem:[%s1608_s7] sm:$0xff] }
 0x3ad   : > { %836 = vmatpush.bf16.msra.mxu0 %v1137_v58 }
 0x3ae   : > { %v588_v0 = vpack.c.bf16 %v587_v63, %v587_v63 }
 0x3b0   : > { %1073 = vmatmul.msk.bf16.vlgmr.msra.gmra.mxu2 %vm556_vm7, %v588_v0 }
 0x3b1   : > { %837 = vmatpush.bf16.msra.mxu0 %v1136_v61 }
 0x3b4   : > { %v748_v1 = vpop.permute.xlu2 %747 }
 0x3b5   : > { %1078 = vmatmul.msk.bf16.vlgmr.msra.gmra.mxu3 %vm556_vm7, %v748_v1  ;;  %v1205_v1 = vld [vmem:[%s1609_s8] ss:$0 sm:$0xff] }
 0x3bc   : > { %v682_v2 = vpop.permute.xlu2 %681 }
 0x3bd   : > { %1076 = vmatmul.msk.bf16.vlgmr.msrb.gmra.mxu0 %vm556_vm7, %v682_v2 }
 0x3c0   : > { %1074 = vmatmul.msk.bf16.vlgmr.msrb.gmra.mxu2 %vm556_vm7, %v616_v62 }
 0x433   : > { %v607_v3 = vpop.f32.mrf.mxu2 }
 0x434   : > { %611 = vst.msk [vmem:[#allocation3] sm:$0xff] %vm556_vm7, %v607_v3 }
 0x438   : > { %v766_v4 = vpop.f32.mrf.mxu3 }
 0x439   : > { %v770_v5 = vsel %vm550_vm8, %v766_v4, -1e+30 }
 0x43a   : > { %v700_v6 = vpop.f32.mrf.mxu0  ;;  %v771_v7 = vsel %vm556_vm7, %v770_v5, -inf }
 0x43b   : > { %v704_v9 = vsel %vm550_vm8, %v700_v6, -1e+30  ;;  %v609_v10 = vpop.f32.mrf.mxu2  ;;  %772 = vmax.xlane.f32.xlu0 %v771_v7 }
 0x43c   : > { %v705_v11 = vsel %vm556_vm7, %v704_v9, -inf }
 0x43d   : > { %706 = vmax.xlane.f32.xlu2 %v705_v11 }
 0x440   : > { %v768_v12 = vpop.f32.mrf.mxu3 }
 0x442   : > { %v702_v13 = vpop.f32.mrf.mxu0 }
 0x443   : > { %v634_v14 = vpop.f32.mrf.mxu2  ;;  %v1139_v13 = vld [vmem:[%s1610_s9 + $0x8] sm:$0xff] }
 0x444   : > { %v638_v15 = vsel %vm550_vm8, %v634_v14, -1e+30  ;;  %v1147_v14 = vld [vmem:[%s1612_s11 + $0x38] sm:$0xff] }
 0x445   : > { %v639_v16 = vsel %vm556_vm7, %v638_v15, -inf  ;;  %967 = vmatpush.bf16.msrb.mxu3 %v1147_v14 }
 0x446   : > { %640 = vmax.xlane.f32.xlu1 %v639_v16 }
 0x44b   : > { %v636_v17 = vpop.f32.mrf.mxu2 }
 0x455   : > { %783 = vrot.lane.b32.xlu2 %v1462_v37, %s1307_s16 }
 0x4ae   : > { %v773_v28 = vpop.xlane.xlu0 %772 }
 0x4af   : > { %v774_v29 = vsub.f32 %v770_v5, %v773_v28 }
 0x4b0   : > { %v707_v18 = vpop.xlane.xlu2 %706 }
 0x4b1   : > { %v708_v19 = vsub.f32 %v704_v9, %v707_v18  ;;  %v775_v31 = vmul.f32 1.442695, %v774_v29 }
 0x4b3   : > { %v709_v20 = vmul.f32 1.442695, %v708_v19 }
 0x4b5   : > { %1218 = vpow2.f32 %v709_v20 }
 0x4b8   : > { %v784_v42 = vpop.permute.xlu2 %783 }
 0x4b9   : > { %v641_v21 = vpop.xlane.xlu1 %640  ;;  %v789_v46 = vsel %vm594_vm6, %v784_v42, 0 }
 0x4ba   : > { %v642_v22 = vsub.f32 %v638_v15, %v641_v21 }
 0x4bb   : > { %v1219_v23 = vpop.eup %1218 }
 0x4bc   : > { %v643_v24 = vmul.f32 1.442695, %v642_v22  ;;  %v711_v25 = vsel %vm556_vm7, %v1219_v23, 0.0 }
 0x4bd   : > { %712 = vadd.xlane.f32.xlu0 %v711_v25 }
 0x4be   : > { %1220 = vpow2.f32 %v643_v24  ;;  %v1206_v24 = vld [vmem:[%s1624_s3] ss:$0 sm:$0xff] }
 0x4bf   : > { %1222 = vpow2.f32 %v775_v31  ;;  %v1146_v31 = vld [vmem:[%s1612_s11 + $0x30] sm:$0xff] }
 0x4c0   : > { %968 = vmatpush.bf16.msrb.mxu3 %v1146_v31 }
 0x4c4   : > { %v1221_v26 = vpop.eup %1220 }
 0x4c5   : > { %v645_v27 = vsel %vm556_vm7, %v1221_v26, 0.0  ;;  %v1223_v32 = vpop.eup %1222 }
 0x4c6   : > { %646 = vadd.xlane.f32.xlu1 %v645_v27  ;;  %v777_v33 = vsel %vm556_vm7, %v1223_v32, 0.0 }
 0x4d1   : > { %717 = vrot.lane.b32.xlu0 %v1462_v37, %s1308_s20 }
 0x4df   : > { %651 = vrot.lane.b32.xlu1 %v1462_v37, %s1309_s21  ;;  %s431_s21 = scalar_lea.vmem [#allocation4], %s1061_s1  ;;  %s1254_s1 = scalar_lea.hbm %s1614_s13, 16 }
 0x509   : > { %778 = vadd.xlane.f32.xlu1 %v777_v33  ;;  %v1144_v33 = vld [vmem:[%s1612_s11 + $0x20] sm:$0xff] }
 0x530   : > { %v713_v34 = vpop.xlane.xlu0 %712 }
 0x531   : > { %1224 = vrcp.f32 %v713_v34  ;;  %v1143_v34 = vld [vmem:[%s1612_s11 + $0x18] sm:$0xff] }
 0x537   : > { %v1225_v35 = vpop.eup %1224 }
 0x538   : > { %v715_v36 = vmul.f32 %v1225_v35, %v1219_v23  ;;  %v1142_v35 = vld [vmem:[%s1612_s11 + $0x10] sm:$0xff] }
 0x539   : > { %v647_v39 = vpop.xlane.xlu1 %646 }
 0x53a   : > { %v716_v41 = vpack.c.bf16 %v715_v36, %v715_v36  ;;  %1226 = vrcp.f32 %v647_v39  ;;  %v1141_v36 = vld [vmem:[%s1612_s11 + $0x8] sm:$0xff]  ;;  %v1208_v39 = vld [vmem:[%s1611_s10] ss:$0 sm:$0xff] }
 0x540   : > { %v1227_v37 = vpop.eup %1226 }
 0x541   : > { %v649_v43 = vmul.f32 %v1227_v37, %v1221_v26 }
 0x543   : > { %v718_v38 = vpop.permute.xlu0 %717  ;;  %v650_v47 = vpack.c.bf16 %v649_v43, %v649_v43 }
 0x544   : > { %v723_v40 = vsel %vm594_vm6, %v718_v38, 0  ;;  %v1140_v38 = vld [vmem:[%s1612_s11] sm:$0xff] }
 0x545   : > { %732 = vmatpush.bf16.msrb.mxu1 %v723_v40 }
 0x548   : > { %1077 = vmatmul.msk.bf16.vlgmr.msrb.gmra.mxu1 %vm556_vm7, %v716_v41 }
 0x549   : > { %899 = vmatpush.bf16.msra.mxu1 %v1139_v13 }
 0x551   : > { %v652_v44 = vpop.permute.xlu1 %651 }
 0x552   : > { %v657_v45 = vsel %vm594_vm6, %v652_v44, 0 }
 0x553   : > { %666 = vmatpush.bf16.msra.mxu2 %v657_v45 }
 0x556   : > { %1075 = vmatmul.msk.bf16.vlgmr.msra.gmra.mxu2 %vm556_vm7, %v650_v47 }
 0x557   : > { %798 = vmatpush.bf16.msrb.mxu2 %v789_v46 }
 0x57c   : > { %v779_v48 = vpop.xlane.xlu1 %778 }
 0x57d   : > { %1228 = vrcp.f32 %v779_v48 }
 0x583   : > { %v1229_v49 = vpop.eup %1228 }
 0x584   : > { %v781_v50 = vmul.f32 %v1229_v49, %v1223_v32  ;;  %v1145_v32 = vld [vmem:[%s1612_s11 + $0x28] sm:$0xff] }
 0x585   : > { %969 = vmatpush.bf16.msrb.mxu3 %v1145_v32 }
 0x586   : > { %v782_v51 = vpack.c.bf16 %v781_v50, %v781_v50 }
 0x588   : > { %1079 = vmatmul.msk.bf16.vlgmr.msrb.gmra.mxu2 %vm556_vm7, %v782_v51 }
 0x589   : > { %970 = vmatpush.bf16.msrb.mxu3 %v1144_v33 }
 0x58d   : > { %971 = vmatpush.bf16.msrb.mxu3 %v1143_v34 }
 0x591   : > { %972 = vmatpush.bf16.msrb.mxu3 %v1142_v35 }
 0x595   : > { %973 = vmatpush.bf16.msrb.mxu3 %v1141_v36 }
 0x599   : > { %974 = vmatpush.bf16.msrb.mxu3 %v1140_v38 }
 0x5c5   : > { %v734_v52 = vpop.f32.mrf.mxu1 }
 0x5c6   : > { %739 = vrot.lane.b32.xlu0 %v734_v52, %s1310_s22  ;;  %v1209_v52 = vld [vmem:[%s1613_s12] ss:$0 sm:$0xff]  ;;  %s995_s22 = sshll.u32 %s431_s21, 4  ;;  %s996_s22 = int_to_ptr.vmem [resolvable:$true] %s995_s22 }
 0x5cd   : > { %v736_v53 = vpop.f32.mrf.mxu1 }
 0x5d9   : > { %v668_v54 = vpop.f32.mrf.mxu2 }
 0x5da   : > { %673 = vrot.lane.b32.xlu2 %v668_v54, %s1311_s23  ;;  %s1131_s23 = sshll.u32 %s1404_s29, 3  ;;  %s983_s29 = scalar_lea.sflag [#allocation5], %s429_s0 }
 0x5db   : > { %s993_s20 = scalar_lea.hbm %s1614_s13, %s1131_s23 }
 0x5dc   : > { %s997_s2 = sshll.u32 %s993_s20, 4  ;;  %s998_s2 = int_to_ptr.hbm [resolvable:$true] %s997_s2 }
 0x5dd   : > { %s1248_s3 = sshra.s32 %s998_s2, 4  ;;  %s1249_s3 = int_to_ptr.hbm [resolvable:$true] %s1248_s3 }
 0x5de   : > { %p1255_p0 = scmp.lt.s32.totalorder %s1249_s3, %s1614_s13 }
 0x5e1   : > { %v670_v55 = vpop.f32.mrf.mxu2 }
 0x60b   : > { %v800_v56 = vpop.f32.mrf.mxu2 }
 0x60c   : > { %805 = vrot.lane.b32.xlu2 %v800_v56, %s1312_s24  ;;  %s1250_s24 = scalar_lea.hbm %s1249_s3, 8 }
 0x60d   : > { %p1251_p11 = scmp.ne.s32.totalorder %s1249_s3, %s1250_s24  ;;  %p1256_p1 = scmp.lt.s32.totalorder %s1254_s1, %s1250_s24 }
 0x60f   : > { %p1252_p12 = pnand %p1251_p11, %p1421_p5  ;;  %p1257_p2 = por %p1256_p1, %p1255_p0 }
 0x611   : > { %p1253_p13 = pneg %p1252_p12 }
 0x613   : > { %v802_v57 = vpop.f32.mrf.mxu2  ;;  %p1258_p3 = pnand %p1257_p2, %p1253_p13 }
 0x634   : > { %v674_v59 = vpop.permute.xlu2 %673 }
 0x635   : > { %677 = vst.msk [vmem:[#allocation3] sm:$0xff] %vm676_vm9, %v674_v59 }
 0x638   : > { %v740_v60 = vpop.permute.xlu0 %739 }
 0x639   : > { %743 = vst.msk [vmem:[#allocation3] sm:$0xff] %vm742_vm10, %v740_v60 }
 0x666   : > { %v806_v62 = vpop.permute.xlu2 %805 }
 0x667   : > { %809 = vst.msk [vmem:[#allocation3] sm:$0xff] %vm808_vm11, %v806_v62 }
 0x66e   : > { %v810_v63 = vld [vmem:[#allocation3] sm:$0xff] }
 0x66f   : > { %v811_v0 = vpack.c.bf16 %v810_v63, %v810_v63 }
 0x671   : > { %1088 = vmatmul.msk.bf16.vlgmr.msra.gmra.mxu0 %vm474_vm0, %v811_v0 }
 0x6ee   : > { %v839_v2 = vpop.f32.mrf.mxu0 }
 0x6ef   : > { %v840_v3 = vadd.f32 %v1205_v1, %v839_v2 }
 0x6f1   : > { %v1516_v4 = vadd.f32 %v840_v3, %v1454_v30  ;;  %v1138_v30 = vld [vmem:[%s1610_s9] sm:$0xff] }
 0x6f2   : > { %900 = vmatpush.bf16.msra.mxu1 %v1138_v30 }
 0x6f3   : > { %v844_v5 = vsel %vm474_vm0, %v1516_v4, 0.0 }
 0x6f4   : > { %845 = vadd.xlane.f32.xlu0 %v844_v5 }
 0x6f6   : > { %v841_v6 = vpop.f32.mrf.mxu0 }
 0x767   : > { %v846_v7 = vpop.xlane.xlu0 %845 }
 0x768   : > { %v847_v9 = vmul.f32 %v846_v7, %v1437_v8 }
 0x76a   : > { %v848_v10 = vsub.f32 %v1516_v4, %v847_v9 }
 0x76c   : > { %v849_v11 = vmul.f32 %v848_v10, %v848_v10 }
 0x76e   : > { %v850_v12 = vsel %vm474_vm0, %v849_v11, 0.0 }
 0x76f   : > { %851 = vadd.xlane.f32.xlu1 %v850_v12 }
 0x7e2   : > { %v852_v15 = vpop.xlane.xlu1 %851 }
 0x7e3   : > { %v853_v16 = vmul.f32 %v852_v15, %v1437_v8  ;;  %v1207_v8 = vld [vmem:[%s1605_s4] ss:$0 sm:$0xff] }
 0x7e5   : > { %v854_v17 = vadd.f32 1e-05, %v853_v16 }
 0x7e7   : > { %1230 = vrsqrt.f32 %v854_v17  ;;  %vm861_vm13 = vweird.f32 %v854_v17 }
 0x7ed   : > { %v1231_v18 = vpop.eup %1230 }
 0x7ee   : > { %v856_v19 = vmul.f32 %v1231_v18, %v854_v17  ;;  %vm862_vm12 = vweird.f32 %v1231_v18 }
 0x7ef   : > { %vm863_vm14 = vmor %vm861_vm13, %vm862_vm12 }
 0x7f0   : > { %v857_v20 = vmul.f32 %v1231_v18, %v856_v19 }
 0x7f2   : > { %v858_v21 = vmul.f32 0.5, %v857_v20 }
 0x7f4   : > { %v859_v22 = vsub.f32 1.5, %v858_v21 }
 0x7f6   : > { %v860_v23 = vmul.f32 %v1231_v18, %v859_v22 }
 0x7f8   : > { %v864_v25 = vsel %vm863_vm14, %v1231_v18, %v860_v23 }
 0x7f9   : > { %v865_v26 = vmul.f32 %v864_v25, %v848_v10 }
 0x7fb   : > { %v869_v27 = vmul.f32 %v1206_v24, %v865_v26 }
 0x7fd   : > { %v873_v28 = vadd.f32 %v1207_v8, %v869_v27 }
 0x7ff   : > { %v874_v29 = vpack.c.bf16 %v873_v28, %v873_v28 }
 0x801   : > { %1097 = vmatmul.msk.bf16.vlgmr.msra.gmra.mxu1 %vm474_vm0, %v874_v29 }
 0x87e   : > { %v902_v40 = vpop.f32.mrf.mxu1 }
 0x87f   : > { %v903_v41 = vadd.f32 %v1208_v39, %v902_v40 }
 0x881   : > { %v906_v37 = vmul.f32 %v903_v41, %v903_v41 }
 0x883   : > { %v907_v42 = vmul.f32 %v906_v37, %v903_v41 }
 0x885   : > { %v908_v43 = vmul.f32 0.044715, %v907_v42 }
 0x886   : > { %v904_v44 = vpop.f32.mrf.mxu1 }
 0x887   : > { %v909_v45 = vadd.f32 %v908_v43, %v903_v41 }
 0x889   : > { %v910_v46 = vmul.f32 0.7978846, %v909_v45 }
 0x88b   : > { %1232 = vtanh.f32 %v910_v46 }
 0x891   : > { %v1233_v47 = vpop.eup %1232 }
 0x892   : > { %v912_v48 = vadd.f32 1.0, %v1233_v47 }
 0x894   : > { %v913_v49 = vmul.f32 0.5, %v912_v48 }
 0x896   : > { %v914_v50 = vmul.f32 %v913_v49, %v903_v41 }
 0x898   : > { %v915_v51 = vpack.c.bf16 %v914_v50, %v914_v50 }
 0x89a   : > { %975 = vmatmul.bf16.vlgmr.msrb.gmra.mxu3 %v915_v51 }
 0x91d   : > { %v976_v53 = vpop.f32.mrf.mxu3 }
 0x91e   : > { %v977_v54 = vadd.f32 %v1209_v52, %v976_v53 }
 0x920   : > { %v980_v55 = vadd.f32 %v977_v54, %v1516_v4 }
 0x922   : > { %981 = vst.msk [vmem:[%s431_s21] sm:$0xff] %vm474_vm0, %v980_v55 }
 0x923   : > { %1261 = shalt.err (!%p1258_p3)
}
 0x924   : > { %1148 = dma.vmem_to_hbm [thread:$0]  (%p1421_p5), %s996_s22, 128, %s998_s2, %s983_s29  }
 0x925   : > { %v978_v56 = vpop.f32.mrf.mxu3 }
 0x926 PF: > { %p1154_p4 = scmp.ge.s32.totalorder %s1296_s28, 2  ;;  %s1009_s0 = sand.u32 1, %s1284_s25  }
 0x927   : > { %s1010_s20 = scalar_lea.sflag [#allocation5], %s1009_s0 }
 0x928   : > { %p1151_p7 = pnand %p1154_p4, %p1425_p6 }
 0x92a   : > { %p1152_p8 = pneg %p1151_p7 }
 0x92c   : > { %1279 = dma.done.wait (%p1152_p8), %s1010_s20, 128  }
 0x92d   : > { %1281 = vsyncadd (%p1152_p8), %s1010_s20, 4294967168  ;;  %p23_p9 = scmp.ge.s32.totalorder %s1408_s14, 4   ;;  %s1625_s25 = smov %s1288_s26 }
 0x92e   : > { %s1626_s26 = smov %s1292_s27  ;;  %s1627_s27 = smov %s1419_s17 }
 0x92f   : > { %s1628_s28 = smov %s1408_s14  ;;  %25 = sbr.rel (!%p23_p9) target bundleno = 8 (0x8), region = 107 }
 0x934   :  { %1016 = vsyncpa [#allocation5], 1 }
 0x935   :  { %1018 = vsyncpa [#allocation5 + $0x1], 1 }

</bundles_post_ra>
